<compile_context>
chip_gen: v6e
topology: v6e:2x2x1
jax: 0.10.0
libtpu: 0.0.40
codegen_flags: <defaults>
</compile_context>

<pallas_src>
import jax
import jax.numpy as jnp
from jax.experimental import pallas as pl
from jax.experimental.pallas import tpu as pltpu


def _fused_conv_block_kernel(x_ref, w1_ref, b1_ref, w2_ref, b2_ref, alpha_ref, o_ref):
    """Fused (conv3x3-reflect + BN + PReLU) x 2 for one (batch, row-tile) grid point.

    x_ref:     (1, H, W*Cin)            whole lane-merged image for this batch element
    w1_ref:    (3*W*Cin, W*Cout)        layer-1 weights; dx taps, reflect-W and BN1 scale folded
    b1_ref:    (1, W*Cout)              layer-1 folded BN shift (tiled over W)
    w2_ref:    (3*W*Cout, W*Cout)       layer-2 weights, same folding
    b2_ref:    (1, W*Cout)              layer-2 folded BN shift
    alpha_ref: (2,)  [SMEM]             PReLU slopes (layer 1, layer 2)
    o_ref:     (1, TH, W*Cout)          lane-dense output row tile
    """
    H = x_ref.shape[1]
    TH = o_ref.shape[1]

    t = pl.program_id(1)
    n_t = pl.num_programs(1)

    r0 = t * TH
    if TH % 8 == 0:
        r0 = pl.multiple_of(r0, 8)

    def refl(i):
        # Reflect-pad-1 row index for i in [-1, H]; clamped for the 2 outermost halo
        # rows (whose results are always overwritten by the y1 top/bot selection below).
        i = jnp.where(i < 0, -i, i)
        i = jnp.where(i > H - 1, 2 * (H - 1) - i, i)
        return jnp.clip(i, 0, H - 1)

    def row(i):                               # one input row -> (1, W*Cin)
        return x_ref[0, pl.ds(refl(i), 1), :]

    # Haloed row window: x rows r0-2 .. r0+TH+1 (reflected at the global edges).
    # Reflection along W is folded into the weight matrices, so no column shifts here.
    win = jnp.concatenate(
        [row(r0 - 2), row(r0 - 1),
         x_ref[0, pl.ds(r0, TH), :],
         row(r0 + TH), row(r0 + TH + 1)],
        axis=0).astype(jnp.float32)           # (TH+4, W*Cin)

    a1 = alpha_ref[0]
    a2 = alpha_ref[1]

    # ---- layer 1: single lane-dense matmul (dy taps stacked on K) -> +shift ->
    #      (Dropout = identity in eval) -> PReLU ----
    M1 = TH + 2                                                        # rows r0-1 .. r0+TH
    taps1 = jnp.concatenate([win[0:M1], win[1:M1 + 1], win[2:M1 + 2]], axis=-1)  # (M1, 3*W*Cin)
    y1 = jnp.dot(taps1, w1_ref[...], preferred_element_type=jnp.float32) + b1_ref[...]
    y1 = jnp.where(y1 >= 0, y1, a1 * y1)                               # (TH+2, W*Cout)

    # Invariant: TH >= 2. At the global top/bottom the out-of-range halo rows of y1
    # must be y1's own reflection (y1[-1] = y1[1], y1[H] = y1[H-2]); interior tiles
    # keep the recomputed neighbour rows.
    top = jnp.where(t == 0, y1[2:3], y1[0:1])
    bot = jnp.where(t == n_t - 1, y1[TH - 1:TH], y1[TH + 1:TH + 2])
    y1p = jnp.concatenate([top, y1[1:TH + 1], bot], axis=0)            # (TH+2, W*Cout)

    # ---- layer 2 ----
    taps2 = jnp.concatenate([y1p[0:TH], y1p[1:TH + 1], y1p[2:TH + 2]], axis=-1)  # (TH, 3*W*Cout)
    y2 = jnp.dot(taps2, w2_ref[...], preferred_element_type=jnp.float32) + b2_ref[...]
    y2 = jnp.where(y2 >= 0, y2, a2 * y2)                               # (TH, W*Cout)

    o_ref[...] = y2[None].astype(o_ref.dtype)


def fold_bn(gamma, beta, mean, var, eps=1e-5):
    scale = gamma / jnp.sqrt(var + eps)
    shift = beta - mean * scale
    return scale, shift


def _reflect_col_select(W):
    """R[dx, w_out, w_in] = 1 iff w_in == reflect(w_out + dx - 1)  (reflect pad 1)."""
    o = jnp.arange(W)
    mats = []
    for dx in range(3):
        src = o + dx - 1
        src = jnp.where(src < 0, -src, src)
        src = jnp.where(src > W - 1, 2 * (W - 1) - src, src)
        mats.append((src[:, None] == jnp.arange(W)[None, :]).astype(jnp.float32))
    return jnp.stack(mats)                     # (3, W_out, W_in)


def _lane_merged_weight(w_hwio, scale, W):
    """(3, 3, Cin, Cout) HWIO conv weight -> (3*W*Cin, W*Cout) lane-merged matrix.

    Folds the BN scale, the three dx taps and the reflect-W padding into the weight so
    the kernel's K axis is (dy, w_in, ci) and its N axis is (w_out, co): one matmul per
    dy-stacked row window, producing a lane-dense (rows, W*Cout) result directly.
    """
    _, _, Cin, Cout = w_hwio.shape
    w = w_hwio.astype(jnp.float32) * scale[None, None, None, :]
    R = _reflect_col_select(W)                                 # (3, W_out, W_in)
    A = jnp.einsum('xoi,yxcd->yicod', R, w)                    # (dy, W_in, Cin, W_out, Cout)
    return A.reshape(3 * W * Cin, W * Cout)


def _pick_block_h(H, target=64):
    """Largest divisor of H <= target, preferring multiples of 8 (sublane-aligned tiles)."""
    if H <= target:
        return H
    start = target - (target % 8)
    for th in range(start, 7, -8):             # multiples of 8 first
        if H % th == 0:
            return th
    for th in range(target, 1, -1):
        if H % th == 0:
            return th
    return H


def conv_block_forward(x_nchw, params, block_h=None):
    """Full Conv_block forward. Input/output are NCHW to match PyTorch.

    In a full JAX model, keep activations NHWC / lane-merged end-to-end and only convert
    at the model boundary; the transposes here exist solely to match the PyTorch interface.
    """
    N, Cin, H, W = x_nchw.shape
    Cout = params["w1"].shape[-1]
    assert H >= 2 and W >= 2, "reflect padding of 1 needs spatial dims >= 2"

    # NCHW -> NHWC -> lane-merged (N, H, W*Cin). The reshape is metadata-only.
    x = jnp.transpose(x_nchw, (0, 2, 3, 1)).astype(jnp.float32).reshape(N, H, W * Cin)

    s1, b1 = fold_bn(params["gamma1"], params["beta1"], params["mean1"], params["var1"])
    s2, b2 = fold_bn(params["gamma2"], params["beta2"], params["mean2"], params["var2"])

    w1m = _lane_merged_weight(params["w1"], s1, W)             # (3*W*Cin,  W*Cout)
    w2m = _lane_merged_weight(params["w2"], s2, W)             # (3*W*Cout, W*Cout)
    shift1 = jnp.tile(b1.astype(jnp.float32), W).reshape(1, W * Cout)
    shift2 = jnp.tile(b2.astype(jnp.float32), W).reshape(1, W * Cout)
    alphas = jnp.stack([jnp.asarray(params["alpha1"], jnp.float32),
                        jnp.asarray(params["alpha2"], jnp.float32)])

    if block_h is None:
        block_h = _pick_block_h(H)
    assert H % block_h == 0 and block_h >= 2, (H, block_h)
    n_t = H // block_h

    # Advisory cost estimate (logical conv FLOPs; structural zeros in the folded
    # weights are not counted) so XLA can overlap the boundary transposes.
    flops = 2 * 9 * N * H * W * Cout * (Cin + Cout)
    bytes_accessed = 4 * (x.size + N * H * W * Cout + w1m.size + w2m.size)

    out = pl.pallas_call(
        _fused_conv_block_kernel,
        out_shape=jax.ShapeDtypeStruct((N, H, W * Cout), x_nchw.dtype),
        grid=(N, n_t),
        in_specs=[
            # whole lane-merged image per batch element; block index constant in t
            pl.BlockSpec((1, H, W * Cin), lambda n, t: (n, 0, 0)),
            pl.BlockSpec((3 * W * Cin, W * Cout), lambda n, t: (0, 0)),
            pl.BlockSpec((1, W * Cout), lambda n, t: (0, 0)),
            pl.BlockSpec((3 * W * Cout, W * Cout), lambda n, t: (0, 0)),
            pl.BlockSpec((1, W * Cout), lambda n, t: (0, 0)),
            pl.BlockSpec(memory_space=pltpu.SMEM),
        ],
        out_specs=pl.BlockSpec((1, block_h, W * Cout), lambda n, t: (n, t, 0)),
        compiler_params=pltpu.CompilerParams(
            dimension_semantics=("parallel", "parallel")),
        cost_estimate=pl.CostEstimate(flops=flops, transcendentals=0,
                                      bytes_accessed=bytes_accessed),
    )(x, w1m, shift1, w2m, shift2, alphas)

    # (N, H, W*Cout) -> (N, H, W, Cout) is metadata-only; then back to NCHW.
    return jnp.transpose(out.reshape(N, H, W, Cout), (0, 3, 1, 2))


def reference_forward(x_nchw, params):
    """Pure-JAX reference (same eval-mode semantics) for validation."""
    x = jnp.transpose(x_nchw, (0, 2, 3, 1))

    def layer(x, w, gamma, beta, mean, var, alpha, eps=1e-5):
        xp = jnp.pad(x, ((0, 0), (1, 1), (1, 1), (0, 0)), mode="reflect")
        y = jax.lax.conv_general_dilated(
            xp, w, window_strides=(1, 1), padding="VALID",
            dimension_numbers=("NHWC", "HWIO", "NHWC"))
        y = (y - mean) / jnp.sqrt(var + eps) * gamma + beta
        return jnp.where(y >= 0, y, alpha * y)

    y = layer(x, params["w1"], params["gamma1"], params["beta1"],
              params["mean1"], params["var1"], params["alpha1"])
    y = layer(y, params["w2"], params["gamma2"], params["beta2"],
              params["mean2"], params["var2"], params["alpha2"])
    return jnp.transpose(y, (0, 3, 1, 2))


def init_params(key, in_channels, out_channels):
    k1, k2 = jax.random.split(key)
    return {
        # conv weights stored HWIO
        "w1": 0.1 * jax.random.normal(k1, (3, 3, in_channels, out_channels), jnp.float32),
        "w2": 0.1 * jax.random.normal(k2, (3, 3, out_channels, out_channels), jnp.float32),
        # BatchNorm params / running stats (deterministic, non-trivial)
        "gamma1": 1.0 + 0.05 * jnp.arange(out_channels, dtype=jnp.float32),
        "beta1": 0.02 * jnp.arange(out_channels, dtype=jnp.float32),
        "mean1": 0.01 * jnp.arange(out_channels, dtype=jnp.float32),
        "var1": 1.0 + 0.1 * jnp.arange(out_channels, dtype=jnp.float32),
        "gamma2": 0.9 + 0.03 * jnp.arange(out_channels, dtype=jnp.float32),
        "beta2": -0.01 * jnp.arange(out_channels, dtype=jnp.float32),
        "mean2": 0.02 * jnp.arange(out_channels, dtype=jnp.float32),
        "var2": 1.0 + 0.05 * jnp.arange(out_channels, dtype=jnp.float32),
        # nn.PReLU() default: a single shared slope initialised to 0.25
        "alpha1": 0.25,
        "alpha2": 0.25,
    }


if __name__ == "__main__":
    N, Cin, Cout, H, W = 2, 4, 8, 16, 16
    key = jax.random.PRNGKey(0)
    kx, kp = jax.random.split(key)
    x = jax.random.normal(kx, (N, Cin, H, W), jnp.float32)
    params = init_params(kp, Cin, Cout)

    ref = jax.block_until_ready(reference_forward(x, params))

    # Multi-row-tile path (2 tiles of 8 rows): exercises the halo / reflect handling.
    out = jax.block_until_ready(conv_block_forward(x, params, block_h=8))
    assert out.shape == (N, Cout, H, W), out.shape
    assert jnp.allclose(out, ref, atol=1e-4, rtol=1e-4), float(jnp.max(jnp.abs(out - ref)))

    # Single-tile path (whole image in one row tile, default block_h).
    out1 = jax.block_until_ready(conv_block_forward(x, params))
    assert jnp.allclose(out1, ref, atol=1e-4, rtol=1e-4), float(jnp.max(jnp.abs(out1 - ref)))

    print("KERNEL_OK")
</pallas_src>

<mosaic_0001>
module attributes {stable_mosaic.version = 11 : i64} {
  func.func @_fused_conv_block_kernel(%arg0: i32, %arg1: i32, %arg2: memref<1x16x64xf32, #tpu.memory_space<vmem>>, %arg3: memref<192x128xf32, #tpu.memory_space<vmem>>, %arg4: memref<1x128xf32, #tpu.memory_space<vmem>>, %arg5: memref<384x128xf32, #tpu.memory_space<vmem>>, %arg6: memref<1x128xf32, #tpu.memory_space<vmem>>, %arg7: memref<2xf32, #tpu.memory_space<smem>>, %arg8: memref<1x8x128xf32, #tpu.memory_space<vmem>>) attributes {dimension_semantics = [#tpu.dimension_semantics<parallel>, #tpu.dimension_semantics<parallel>], iteration_bounds = array<i64: 2, 2>, scalar_prefetch = 0 : i64, scratch_operands = 0 : i64, tpu.core_type = #tpu.core_type<tc>, window_params = [{transform_indices = @transform_0, window_bounds = array<i64: 1, 16, 64>}, {pipeline_mode = #tpu.pipeline_mode<synchronous>, transform_indices = @transform_1, window_bounds = array<i64: 192, 128>}, {pipeline_mode = #tpu.pipeline_mode<synchronous>, transform_indices = @transform_2, window_bounds = array<i64: 1, 128>}, {pipeline_mode = #tpu.pipeline_mode<synchronous>, transform_indices = @transform_3, window_bounds = array<i64: 384, 128>}, {pipeline_mode = #tpu.pipeline_mode<synchronous>, transform_indices = @transform_4, window_bounds = array<i64: 1, 128>}, {transform_indices = @transform_5, window_bounds = array<i64: 2>}, {transform_indices = @transform_6, window_bounds = array<i64: 1, 8, 128>}]} {
    %c8_i32 = arith.constant 8 : i32
    %0 = arith.muli %arg1, %c8_i32 : i32
    %1 = tpu.assume_multiple %0, 8 : i32
    %c2_i32 = arith.constant 2 : i32
    %2 = arith.subi %1, %c2_i32 : i32
    %c0_i32 = arith.constant 0 : i32
    %3 = arith.cmpi slt, %2, %c0_i32 : i32
    %c0_i32_0 = arith.constant 0 : i32
    %4 = arith.subi %c0_i32_0, %2 : i32
    %5 = arith.select %3, %4, %2 : i32
    %c15_i32 = arith.constant 15 : i32
    %6 = arith.cmpi sgt, %5, %c15_i32 : i32
    %c30_i32 = arith.constant 30 : i32
    %7 = arith.subi %c30_i32, %5 : i32
    %8 = arith.select %6, %7, %5 : i32
    %c0_i32_1 = arith.constant 0 : i32
    %c15_i32_2 = arith.constant 15 : i32
    %9 = arith.maxsi %c0_i32_1, %8 : i32
    %10 = arith.minsi %c15_i32_2, %9 : i32
    %c0 = arith.constant 0 : index
    %11 = arith.index_cast %10 : i32 to index
    %c0_3 = arith.constant 0 : index
    %12 = vector.load %arg2[%c0, %11, %c0_3] : memref<1x16x64xf32, #tpu.memory_space<vmem>>, vector<1x1x64xf32>
    %13 = vector.shape_cast %12 : vector<1x1x64xf32> to vector<1x64xf32>
    %c1_i32 = arith.constant 1 : i32
    %14 = arith.subi %1, %c1_i32 : i32
    %c0_i32_4 = arith.constant 0 : i32
    %15 = arith.cmpi slt, %14, %c0_i32_4 : i32
    %c0_i32_5 = arith.constant 0 : i32
    %16 = arith.subi %c0_i32_5, %14 : i32
    %17 = arith.select %15, %16, %14 : i32
    %c15_i32_6 = arith.constant 15 : i32
    %18 = arith.cmpi sgt, %17, %c15_i32_6 : i32
    %c30_i32_7 = arith.constant 30 : i32
    %19 = arith.subi %c30_i32_7, %17 : i32
    %20 = arith.select %18, %19, %17 : i32
    %c0_i32_8 = arith.constant 0 : i32
    %c15_i32_9 = arith.constant 15 : i32
    %21 = arith.maxsi %c0_i32_8, %20 : i32
    %22 = arith.minsi %c15_i32_9, %21 : i32
    %c0_10 = arith.constant 0 : index
    %23 = arith.index_cast %22 : i32 to index
    %c0_11 = arith.constant 0 : index
    %24 = vector.load %arg2[%c0_10, %23, %c0_11] : memref<1x16x64xf32, #tpu.memory_space<vmem>>, vector<1x1x64xf32>
    %25 = vector.shape_cast %24 : vector<1x1x64xf32> to vector<1x64xf32>
    %c0_12 = arith.constant 0 : index
    %26 = arith.index_cast %1 : i32 to index
    %c0_13 = arith.constant 0 : index
    %27 = vector.load %arg2[%c0_12, %26, %c0_13] : memref<1x16x64xf32, #tpu.memory_space<vmem>>, vector<1x8x64xf32>
    %28 = vector.shape_cast %27 : vector<1x8x64xf32> to vector<8x64xf32>
    %c8_i32_14 = arith.constant 8 : i32
    %29 = arith.addi %1, %c8_i32_14 : i32
    %c0_i32_15 = arith.constant 0 : i32
    %30 = arith.cmpi slt, %29, %c0_i32_15 : i32
    %c0_i32_16 = arith.constant 0 : i32
    %31 = arith.subi %c0_i32_16, %29 : i32
    %32 = arith.select %30, %31, %29 : i32
    %c15_i32_17 = arith.constant 15 : i32
    %33 = arith.cmpi sgt, %32, %c15_i32_17 : i32
    %c30_i32_18 = arith.constant 30 : i32
    %34 = arith.subi %c30_i32_18, %32 : i32
    %35 = arith.select %33, %34, %32 : i32
    %c0_i32_19 = arith.constant 0 : i32
    %c15_i32_20 = arith.constant 15 : i32
    %36 = arith.maxsi %c0_i32_19, %35 : i32
    %37 = arith.minsi %c15_i32_20, %36 : i32
    %c0_21 = arith.constant 0 : index
    %38 = arith.index_cast %37 : i32 to index
    %c0_22 = arith.constant 0 : index
    %39 = vector.load %arg2[%c0_21, %38, %c0_22] : memref<1x16x64xf32, #tpu.memory_space<vmem>>, vector<1x1x64xf32>
    %40 = vector.shape_cast %39 : vector<1x1x64xf32> to vector<1x64xf32>
    %c8_i32_23 = arith.constant 8 : i32
    %41 = arith.addi %1, %c8_i32_23 : i32
    %c1_i32_24 = arith.constant 1 : i32
    %42 = arith.addi %41, %c1_i32_24 : i32
    %c0_i32_25 = arith.constant 0 : i32
    %43 = arith.cmpi slt, %42, %c0_i32_25 : i32
    %c0_i32_26 = arith.constant 0 : i32
    %44 = arith.subi %c0_i32_26, %42 : i32
    %45 = arith.select %43, %44, %42 : i32
    %c15_i32_27 = arith.constant 15 : i32
    %46 = arith.cmpi sgt, %45, %c15_i32_27 : i32
    %c30_i32_28 = arith.constant 30 : i32
    %47 = arith.subi %c30_i32_28, %45 : i32
    %48 = arith.select %46, %47, %45 : i32
    %c0_i32_29 = arith.constant 0 : i32
    %c15_i32_30 = arith.constant 15 : i32
    %49 = arith.maxsi %c0_i32_29, %48 : i32
    %50 = arith.minsi %c15_i32_30, %49 : i32
    %c0_31 = arith.constant 0 : index
    %51 = arith.index_cast %50 : i32 to index
    %c0_32 = arith.constant 0 : index
    %52 = vector.load %arg2[%c0_31, %51, %c0_32] : memref<1x16x64xf32, #tpu.memory_space<vmem>>, vector<1x1x64xf32>
    %53 = vector.shape_cast %52 : vector<1x1x64xf32> to vector<1x64xf32>
    %54 = tpu.concatenate %13, %25, %28, %40, %53 in 0 : vector<1x64xf32>, vector<1x64xf32>, vector<8x64xf32>, vector<1x64xf32>, vector<1x64xf32> -> vector<12x64xf32>
    %c0_33 = arith.constant 0 : index
    %55 = memref.load %arg7[%c0_33] : memref<2xf32, #tpu.memory_space<smem>>
    %c1 = arith.constant 1 : index
    %56 = memref.load %arg7[%c1] : memref<2xf32, #tpu.memory_space<smem>>
    %57 = vector.extract_strided_slice %54 {offsets = [0, 0], sizes = [10, 64], strides = [1, 1]} : vector<12x64xf32> to vector<10x64xf32>
    %58 = vector.extract_strided_slice %54 {offsets = [1, 0], sizes = [10, 64], strides = [1, 1]} : vector<12x64xf32> to vector<10x64xf32>
    %59 = vector.extract_strided_slice %54 {offsets = [2, 0], sizes = [10, 64], strides = [1, 1]} : vector<12x64xf32> to vector<10x64xf32>
    %60 = tpu.concatenate %57, %58, %59 in 1 : vector<10x64xf32>, vector<10x64xf32>, vector<10x64xf32> -> vector<10x192xf32>
    %c0_34 = arith.constant 0 : index
    %c0_35 = arith.constant 0 : index
    %61 = vector.load %arg3[%c0_34, %c0_35] : memref<192x128xf32, #tpu.memory_space<vmem>>, vector<192x128xf32>
    %cst = arith.constant dense<0.000000e+00> : vector<10x128xf32>
    %62 = tpu.matmul %60, %61, %cst {dimension_numbers = #tpu.dot_dimension_numbers<[1], [0], [0], [1], [0, 0, 1, 1], [], []>} : vector<10x192xf32>, vector<192x128xf32>, vector<10x128xf32> -> vector<10x128xf32>
    %c0_36 = arith.constant 0 : index
    %c0_37 = arith.constant 0 : index
    %63 = vector.load %arg4[%c0_36, %c0_37] : memref<1x128xf32, #tpu.memory_space<vmem>>, vector<1x128xf32>
    %64 = vector.broadcast %63 : vector<1x128xf32> to vector<10x128xf32>
    %65 = arith.addf %62, %64 : vector<10x128xf32>
    %cst_38 = arith.constant 0.000000e+00 : f32
    %66 = vector.broadcast %cst_38 : f32 to vector<10x128xf32>
    %67 = arith.cmpf oge, %65, %66 : vector<10x128xf32>
    %68 = vector.broadcast %55 : f32 to vector<10x128xf32>
    %69 = arith.mulf %68, %65 : vector<10x128xf32>
    %70 = arith.select %67, %65, %69 : vector<10x128xi1>, vector<10x128xf32>
    %c0_i32_39 = arith.constant 0 : i32
    %71 = arith.cmpi eq, %arg1, %c0_i32_39 : i32
    %72 = vector.extract_strided_slice %70 {offsets = [2, 0], sizes = [1, 128], strides = [1, 1]} : vector<10x128xf32> to vector<1x128xf32>
    %73 = vector.extract_strided_slice %70 {offsets = [0, 0], sizes = [1, 128], strides = [1, 1]} : vector<10x128xf32> to vector<1x128xf32>
    %74 = arith.select %71, %72, %73 : vector<1x128xf32>
    %c1_i32_40 = arith.constant 1 : i32
    %75 = arith.cmpi eq, %arg1, %c1_i32_40 : i32
    %76 = vector.extract_strided_slice %70 {offsets = [7, 0], sizes = [1, 128], strides = [1, 1]} : vector<10x128xf32> to vector<1x128xf32>
    %77 = vector.extract_strided_slice %70 {offsets = [9, 0], sizes = [1, 128], strides = [1, 1]} : vector<10x128xf32> to vector<1x128xf32>
    %78 = arith.select %75, %76, %77 : vector<1x128xf32>
    %79 = vector.extract_strided_slice %70 {offsets = [1, 0], sizes = [8, 128], strides = [1, 1]} : vector<10x128xf32> to vector<8x128xf32>
    %80 = tpu.concatenate %74, %79, %78 in 0 : vector<1x128xf32>, vector<8x128xf32>, vector<1x128xf32> -> vector<10x128xf32>
    %81 = vector.extract_strided_slice %80 {offsets = [0, 0], sizes = [8, 128], strides = [1, 1]} : vector<10x128xf32> to vector<8x128xf32>
    %82 = vector.extract_strided_slice %80 {offsets = [1, 0], sizes = [8, 128], strides = [1, 1]} : vector<10x128xf32> to vector<8x128xf32>
    %83 = vector.extract_strided_slice %80 {offsets = [2, 0], sizes = [8, 128], strides = [1, 1]} : vector<10x128xf32> to vector<8x128xf32>
    %84 = tpu.concatenate %81, %82, %83 in 1 : vector<8x128xf32>, vector<8x128xf32>, vector<8x128xf32> -> vector<8x384xf32>
    %c0_41 = arith.constant 0 : index
    %c0_42 = arith.constant 0 : index
    %85 = vector.load %arg5[%c0_41, %c0_42] : memref<384x128xf32, #tpu.memory_space<vmem>>, vector<384x128xf32>
    %cst_43 = arith.constant dense<0.000000e+00> : vector<8x128xf32>
    %86 = tpu.matmul %84, %85, %cst_43 {dimension_numbers = #tpu.dot_dimension_numbers<[1], [0], [0], [1], [0, 0, 1, 1], [], []>} : vector<8x384xf32>, vector<384x128xf32>, vector<8x128xf32> -> vector<8x128xf32>
    %c0_44 = arith.constant 0 : index
    %c0_45 = arith.constant 0 : index
    %87 = vector.load %arg6[%c0_44, %c0_45] : memref<1x128xf32, #tpu.memory_space<vmem>>, vector<1x128xf32>
    %88 = vector.broadcast %87 : vector<1x128xf32> to vector<8x128xf32>
    %89 = arith.addf %86, %88 : vector<8x128xf32>
    %cst_46 = arith.constant 0.000000e+00 : f32
    %90 = vector.broadcast %cst_46 : f32 to vector<8x128xf32>
    %91 = arith.cmpf oge, %89, %90 : vector<8x128xf32>
    %92 = vector.broadcast %56 : f32 to vector<8x128xf32>
    %93 = arith.mulf %92, %89 : vector<8x128xf32>
    %94 = arith.select %91, %89, %93 : vector<8x128xi1>, vector<8x128xf32>
    %95 = vector.shape_cast %94 : vector<8x128xf32> to vector<1x8x128xf32>
    %c0_47 = arith.constant 0 : index
    %c0_48 = arith.constant 0 : index
    %c0_49 = arith.constant 0 : index
    %96 = vector.load %arg8[%c0_47, %c0_48, %c0_49] : memref<1x8x128xf32, #tpu.memory_space<vmem>>, vector<1x8x128xf32>
    tpu.vector_store %arg8[%c0_47, %c0_48, %c0_49], %95 {strides = array<i32>} : memref<1x8x128xf32, #tpu.memory_space<vmem>>, vector<1x8x128xf32>,
    return
  }
  func.func @transform_0(%arg0: i32, %arg1: i32) -> (i32, i32, i32) {
    %c0_i32 = arith.constant 0 : i32
    %c0_i32_0 = arith.constant 0 : i32
    %c0_i32_1 = arith.constant 0 : i32
    return %arg0, %c0_i32, %c0_i32_0 : i32, i32, i32
  }
  func.func @transform_1(%arg0: i32, %arg1: i32) -> (i32, i32) {
    %c0_i32 = arith.constant 0 : i32
    %c0_i32_0 = arith.constant 0 : i32
    %c0_i32_1 = arith.constant 0 : i32
    return %c0_i32, %c0_i32_0 : i32, i32
  }
  func.func @transform_2(%arg0: i32, %arg1: i32) -> (i32, i32) {
    %c0_i32 = arith.constant 0 : i32
    %c0_i32_0 = arith.constant 0 : i32
    %c0_i32_1 = arith.constant 0 : i32
    return %c0_i32, %c0_i32_0 : i32, i32
  }
  func.func @transform_3(%arg0: i32, %arg1: i32) -> (i32, i32) {
    %c0_i32 = arith.constant 0 : i32
    %c0_i32_0 = arith.constant 0 : i32
    %c0_i32_1 = arith.constant 0 : i32
    return %c0_i32, %c0_i32_0 : i32, i32
  }
  func.func @transform_4(%arg0: i32, %arg1: i32) -> (i32, i32) {
    %c0_i32 = arith.constant 0 : i32
    %c0_i32_0 = arith.constant 0 : i32
    %c0_i32_1 = arith.constant 0 : i32
    return %c0_i32, %c0_i32_0 : i32, i32
  }
  func.func @transform_5(%arg0: i32, %arg1: i32) -> i32 {
    %c0_i32 = arith.constant 0 : i32
    %c0_i32_0 = arith.constant 0 : i32
    return %c0_i32 : i32
  }
  func.func @transform_6(%arg0: i32, %arg1: i32) -> (i32, i32, i32) {
    %c0_i32 = arith.constant 0 : i32
    %c0_i32_0 = arith.constant 0 : i32
    return %arg0, %arg1, %c0_i32 : i32, i32, i32
  }
}

</mosaic_0001>

<bundles_post_ra>
// kernel: tpu_custom_call.1
= control target key start
LH: loop header
LB: loop body
LE: loop exit
PB: predicated region body
PF: predicated region fallthrough
CT: control target
= control target key end

     0   :  { %s1818_s0 = inlined_call_operand.hbm [shape: f32[2,16,64], index: 0, kind: input, shape index: {}]   ;;  %s1819_s1 = inlined_call_operand.hbm [shape: f32[192,128], index: 1, kind: input, shape index: {}]   ;;  %s1820_s2 = inlined_call_operand.vmem [shape: f32[1,128], index: 2, kind: input, shape index: {}]   ;;  %s1821_s3 = inlined_call_operand.hbm [shape: f32[384,128], index: 3, kind: input, shape index: {}]   ;;  %s1822_s4 = inlined_call_operand.vmem [shape: f32[1,128], index: 4, kind: input, shape index: {}]   ;;  %s1823_s5 = inlined_call_operand.vmem [shape: f32[2], index: 5, kind: input, shape index: {}]   ;;  %s1824_s6 = inlined_call_operand.hbm [shape: f32[2,16,128], index: 6, kind: output, shape index: {}]  }
   0x1   :  { %1836 = sst [smem:[#allocation21_spill]] %s1819_s1 }
   0x2   :  { %1837 = sst [smem:[#allocation22_spill]] %s1821_s3 }
   0x3   :  { %1838 = sst [smem:[#allocation23_spill]] %s1823_s5 }
   0x4   :  { %1839 = sst [smem:[#allocation24_spill]] %s1824_s6 }
   0x5   :  { %11 = vsyncpa [#allocation3], 0 }
   0x6   :  { %13 = vsyncpa [#allocation3 + $0x1], 0 }
   0x7   :  { %14 = vsyncpa [#allocation7], 0 }
   0x8   :  { %15 = vsyncpa [#allocation5], 0 }
   0x9   :  { %16 = vsyncpa [#allocation4], 0 }
   0xa   :  { %18 = vsyncpa [#allocation4 + $0x1], 0  ;;  %s1462_s21 = smov 0   ;;  %s1464_s22 = smov 0  }
   0xb   :  { %s1466_s23 = smov 0   ;;  %s1468_s24 = smov 0  }
   0xc   :  { %s1470_s25 = smov 0   ;;  %s1472_s26 = smov 0  }
   0xd   :  { %s1474_s27 = smov 0   ;;  %s1476_s28 = smov 0  }
   0xe   :  { %s1478_s29 = smov 0   ;;  %s1480_s30 = smov 0  }
   0xf   :  { %s1482_s7 = smov 0  }
  0x10 LB: > { %1840 = sst [smem:[#allocation15_spill]] %s1375_s21  ;;  %s909_s8 = sadd.s32 4294967295, %s1415_s7   ;;  %s1415_s7 = sphi %s1482_s7, %s24_s7   ;;  %s1411_s30 = sphi %s1480_s30, %s1877_s30   ;;  %s1407_s29 = sphi %s1478_s29, %s1868_s29   ;;  %s1403_s28 = sphi %s1476_s28, %s1876_s28   ;;  %s1399_s27 = sphi %s1474_s27, %s1867_s27   ;;  %s1395_s26 = sphi %s1472_s26, %s1875_s26   ;;  %s1391_s25 = sphi %s1470_s25, %s1874_s25   ;;  %s1387_s24 = sphi %s1468_s24, %s1873_s24   ;;  %s1383_s23 = sphi %s1466_s23, %s1872_s23   ;;  %s1379_s22 = sphi %s1464_s22, %s1871_s22   ;;  %s1375_s21 = sphi %s1462_s21, %s1870_s21  }
  0x11   : > { %1841 = sst [smem:[#allocation16_spill]] %s1407_s29  ;;  %s910_s9 = sadd.s32 4294967294, %s1415_s7  }
  0x12   : > { %p56_p0 = scmp.ne.s32.totalorder %s1391_s25, %s1387_s24  ;;  %p1518_p1 = scmp.eq.s32.totalorder %s909_s8, 0 }
  0x13   : > { %p186_p2 = scmp.ne.s32.totalorder %s1383_s23, %s1379_s22  ;;  %p187_p4 = scmp.eq.s32.totalorder %s909_s8, 3 }
  0x14   : > { %p1527_p3 = por %p1518_p1, %p56_p0  ;;  %p192_p5 = scmp.ne.s32.totalorder %s1379_s22, %s1375_s21 }
  0x15   : > { %p193_p6 = scmp.eq.s32.totalorder %s910_s9, 3  ;;  %p1533_p7 = por %p187_p4, %p186_p2 }
  0x16   : > { %p911_p8 = scmp.ge.s32.totalorder %s1415_s7, 1  ;;  %p200_p10 = scmp.lt.s32.totalorder %s1415_s7, 5 }
  0x17   : > { %s1844_s13 = scalar_select %p1533_p7, 1, 0 }
  0x18   : > { %p1538_p9 = por %p193_p6, %p192_p5  ;;  %p1543_p11 = pnand %p911_p8, %p200_p10 }
  0x19   : > { %1845 = sst [smem:[#allocation17_spill]] %s1844_s13  ;;  %s1417_s16 = smov [#allocation6]  }
  0x1a   : > { %s1846_s14 = scalar_select %p1538_p9, 1, 0 }
  0x1b   : > { %s212_s17 = sshll.u32 %s1417_s16, 4  ;;  %p1070_p12 = pneg %p1543_p11  ;;  %s213_s17 = int_to_ptr.vmem [resolvable:$true] %s212_s17 }
  0x1c   : > { %1847 = sst [smem:[#allocation18_spill]] %s1846_s14  ;;  %s1418_s19 = smov [#allocation8]  }
  0x1d   : > { %p1551_p13 = pnand %p1070_p12, %p1518_p1  ;;  %s228_s20 = sshll.u32 %s1418_s19, 4  ;;  %s229_s20 = int_to_ptr.vmem [resolvable:$true] %s228_s20 }
  0x1e   : > { %s1850_s5 = sld [smem:[#allocation23_spill]]  ;;  %s1203_s16 = scalar_lea.vmem %s213_s17, 3072 }
  0x1f   : > { %p1194_p0 = pneg %p1551_p13  ;;  %p1204_p2 = scmp.ne.s32.totalorder %s213_s17, %s1203_s16 }
  0x20   : > { %p1211_p6 = scmp.lt.s32.totalorder %s213_s17, %s213_s17  ;;  %p1212_p8 = scmp.lt.s32.totalorder %s1203_s16, %s1203_s16 }
  0x21   : > { %p1206_p4 = pnand %p1204_p2, %p1194_p0 }
  0x22   : > { %p1213_p10 = por %p1212_p8, %p1211_p6 }
  0x23   : > { %p1207_p5 = pneg %p1206_p4 }
  0x24   : > { %s245_s9 = sshll.u32 %s1850_s5, 4  ;;  %s1558_s9 = int_to_ptr.vmem [resolvable:$true] %s245_s9 }
  0x25   : > { %p1214_p12 = pnand %p1213_p10, %p1207_p5 }
  0x27   : > { %1217 = shalt.err (!%p1214_p12)
}
  0x28   : > { %s1826_s19 = smov 128   ;;  %s1827_s24 = smov 8  }
  0x29   : > { %s1851_s1 = sld [smem:[#allocation21_spill]]  ;;  %s1229_s5 = scalar_lea.vmem %s229_s20, 6144 }
  0x2a   : > { %p1230_p2 = scmp.ne.s32.totalorder %s229_s20, %s1229_s5  ;;  %p1237_p5 = scmp.lt.s32.totalorder %s229_s20, %s229_s20 }
  0x2b   : > { %p1238_p8 = scmp.lt.s32.totalorder %s1229_s5, %s1229_s5 }
  0x2c   : > { %p1232_p4 = pnand %p1230_p2, %p1194_p0 }
  0x2d   : > { %p1239_p10 = por %p1238_p8, %p1237_p5 }
  0x2e   : > { %p1233_p6 = pneg %p1232_p4 }
  0x2f   : > { %1073 = dma.hbm_to_vmem [thread:$0]  (!%p1551_p13), %s1851_s1, 3072, %s213_s17, [#allocation7], %s1826_s19, %s1826_s19, %s1827_s24  }
  0x30   : > { %p1240_p12 = pnand %p1239_p10, %p1233_p6 }
  0x32   : > { %1243 = shalt.err (!%p1240_p12)
}
  0x33   : > { %s1852_s3 = sld [smem:[#allocation22_spill]]  ;;  %s1244_s11 = scalar_lea.vmem %s1558_s9, 16 }
  0x34   : > { %p1245_p2 = scmp.ne.s32.totalorder %s1558_s9, %s1244_s11  ;;  %p1252_p5 = scmp.lt.s32.totalorder %s1558_s9, %s1558_s9 }
  0x35   : > { %p1253_p8 = scmp.lt.s32.totalorder %s1244_s11, %s1244_s11 }
  0x36   : > { %p1247_p4 = pnand %p1245_p2, %p1194_p0 }
  0x37   : > { %p1254_p10 = por %p1253_p8, %p1252_p5 }
  0x38   : > { %p1248_p6 = pneg %p1247_p4 }
  0x39   : > { %1076 = dma.hbm_to_vmem [thread:$0]  (!%p1551_p13), %s1852_s3, 6144, %s229_s20, [#allocation7], %s1826_s19, %s1826_s19, %s1827_s24  }
  0x3a   : > { %p1255_p12 = pnand %p1254_p10, %p1248_p6 }
  0x3c   : > { %1258 = shalt.err (!%p1255_p12)
}
  0x3d   : > { %s1421_s5 = smov [#allocation9]   ;;  %s33_s14 = sadd.s32 1, %s1407_s29 }
  0x3e   : > { %1079 = dma.vmem_to_smem (!%p1551_p13), %s1558_s9, 16, %s1421_s5, [#allocation5]  }
  0x3f   : > { %p34_p0 = scmp.ge.s32.totalorder %s33_s14, 2  ;;  %s36_s17 = sadd.s32 1, %s1411_s30 }
  0x40   : > { %s43_s20 = sadd.s32 1, %s1395_s26  ;;  %p50_p2 = scmp.ne.s32.totalorder %s1395_s26, %s1391_s25 }
  0x41   : > { %s1879_s14 = smov (%p34_p0, %s33_s14), 0  ;;  %s1881_s17 = smov (!%p34_p0, %s36_s17), %s1411_s30 }
  0x42   : > { %1853 = sst [smem:[#allocation19_spill]] %s1879_s14  ;;  %p51_p4 = scmp.eq.s32.totalorder %s1415_s7, 0 }
  0x43   : > { %s172_s18 = ssub.s32 %s1407_s29, %s1879_s14  ;;  %p38_p6 = scmp.ge.s32.totalorder %s1881_s17, 2 }
  0x44   : > { %p1091_p5 = scmp.lt.s32.totalorder %s1415_s7, 4  ;;  %p1606_p13 = por %p51_p4, %p50_p2 }
  0x45   : > { %s256_s8 = sand.u32 1, %s1395_s26   ;;  %s1883_s17 = smov (%p38_p6, %s1881_s17), 0 }
  0x46   : > { %1855 = sst [smem:[#allocation20_spill]] %s1883_s17  ;;  %s916_s16 = sshll.u32 %s256_s8, 4 }
  0x47   : > { %s40_s11 = ssub.s32 %s1411_s30, %s1883_s17  ;;  %s958_s19 = sshll.u32 %s1411_s30, 8 }
  0x48   : > { %p41_p8 = scmp.eq.s32.totalorder %s40_s11, 0  ;;  %s173_s5 = sor.u32 %s172_s18, %s40_s11 }
  0x49   : > { %p174_p10 = scmp.eq.s32.totalorder %s173_s5, 0  ;;  %s1856_s1 = sadd.s32 1, %s1383_s23 }
  0x4a   : > { %s1617_s24 = scalar_select %p41_p8, %s1395_s26, %s43_s20  }
  0x4b   : > { %s1622_s3 = scalar_select %p174_p10, %s1383_s23, %s1856_s1  }
  0x4c   : > { %s266_s21 = scalar_lea.hbm %s1818_s0, %s958_s19  ;;  %s260_s6 = scalar_lea.vmem [#allocation2], %s916_s16 }
  0x4d   : > { %s267_s13 = sshll.u32 %s260_s6, 4  ;;  %p1631_p12 = pnand %p1091_p5, %p1606_p13  ;;  %s268_s13 = int_to_ptr.vmem [resolvable:$true] %s267_s13 }
  0x4e   : > { %s257_s18 = scalar_lea.sflag [#allocation3], %s256_s8  ;;  %s1272_s20 = scalar_lea.vmem %s268_s13, 256 }
  0x4f   : > { %p1261_p0 = pneg %p1631_p12  ;;  %p1273_p2 = scmp.ne.s32.totalorder %s268_s13, %s1272_s20 }
  0x50   : > { %s1422_s1 = smov [#allocation2]  }
  0x51   : > { %p1275_p4 = pnand %p1273_p2, %p1261_p0  ;;  %s1277_s29 = sshll.u32 %s1422_s1, 4  ;;  %s1278_s29 = int_to_ptr.vmem [resolvable:$false] %s1277_s29 }
  0x52   : > { %s1279_s19 = scalar_lea.vmem %s1278_s29, 512  ;;  %p1280_p8 = scmp.lt.s32.totalorder %s268_s13, %s1278_s29 }
  0x53   : > { %p1276_p6 = pneg %p1275_p4  ;;  %p1281_p10 = scmp.lt.s32.totalorder %s1279_s19, %s1272_s20 }
  0x55   : > { %p1282_p9 = por %p1281_p10, %p1280_p8 }
  0x57   : > { %p1283_p7 = pnand %p1282_p9, %p1276_p6 }
  0x59   : > { %1286 = shalt.err (!%p1283_p7)
}
  0x5a   : > { %s1858_s6 = smov 8   ;;  %s1859_s14 = smov 128  }
  0x5b   : > { %1083 = dma.hbm_to_vmem [thread:$0]  (!%p1631_p12), %s266_s21, 256, %s268_s13, %s257_s18, %s1859_s14, %s1859_s14, %s1858_s6  }
  0x5c   : > { %279 = sbr.rel (%p1543_p11) target bundleno = 711 (0x2c7), region = 44  ;;  %s281_s9 = sand.u32 (!%p1543_p11), 1, %s1391_s25  }
  0x5d   : > { %s920_s8 = sshll.u32 (!%p1543_p11), %s281_s9, 4  ;;  %s282_s16 = scalar_lea.sflag (!%p1543_p11), [#allocation3], %s281_s9 }
  0x5e   : > { %s1645_s11 = scalar_lea.vmem (!%p1543_p11), [#allocation2], %s920_s8 }
  0x61   : > { %1358 = dma.done.wait (%p1527_p3), %s282_s16, 256  }
  0x62   : > { %1360 = vsyncadd (%p1527_p3), %s282_s16, 4294967040 }
  0x63   : > { %1362 = dma.done.wait (%p1518_p1), [#allocation7], 9216  }
  0x64   : > { %1364 = vsyncadd (%p1518_p1), [#allocation7], 4294958080 }
  0x65   : > { %1366 = dma.done.wait (%p1518_p1), [#allocation5], 16  }
  0x66   : > { %1368 = vsyncadd (%p1518_p1), [#allocation5], 4294967280 }
  0x67   : > { %302 = sfence }
  0x68   : > { %s1660_s21 = sshll.u32 %s1399_s27, 3  ;;  %v437_v0 = vld [vmem:[#allocation6 + $0x78] sm:$0xff]  ;;  %v1423_v1 = vmov 0.0   ;;  %v436_v2 = vld [vmem:[#allocation6 + $0x70] sm:$0xff]  ;;  %v435_v3 = vld [vmem:[#allocation6 + $0x68] sm:$0xff]  ;;  %vm394_vm0 = vcmask 1040384  }
  0x69   : > { %s926_s12 = sadd.s32 4294967294, %s1660_s21  ;;  %s330_s13 = ssub.s32 2, %s1660_s21  ;;  %457 = vmatprep.subr.mxu0 %v1423_v1  ;;  %v434_v4 = vld [vmem:[#allocation6 + $0x60] sm:$0xff]  ;;  %v433_v5 = vld [vmem:[#allocation6 + $0x58] sm:$0xff]  ;;  %v432_v6 = vld [vmem:[#allocation6 + $0x50] sm:$0xff]  ;;  %vm396_vm1 = vcmask 1041408  }
  0x6a   : > { %p329_p3 = scmp.lt.s32.totalorder %s926_s12, 0  ;;  %s932_s15 = sadd.s32 4294967295, %s1660_s21  ;;  %458 = vmatpush1.msra.mxu0 %v437_v0  ;;  %v431_v7 = vld [vmem:[#allocation6 + $0x48] sm:$0xff]  ;;  %v430_v8 = vld [vmem:[#allocation6 + $0x40] sm:$0xff]  ;;  %v429_v9 = vld [vmem:[#allocation6 + $0x38] sm:$0xff]  ;;  %vm399_vm2 = vcmask 1042432  }
  0x6b   : > { %p342_p7 = scmp.lt.s32.totalorder %s932_s15, 0  ;;  %s343_s10 = ssub.s32 1, %s1660_s21  ;;  %459 = vmatprep.subr.mxu0 %v1423_v1  ;;  %v428_v10 = vld [vmem:[#allocation6 + $0x30] sm:$0xff]  ;;  %v427_v11 = vld [vmem:[#allocation6 + $0x28] sm:$0xff]  ;;  %v426_v12 = vld [vmem:[#allocation6 + $0x20] sm:$0xff]  ;;  %vm405_vm3 = vcmask 1046528  }
  0x6c   : > { %s1885_s13 = smov (!%p329_p3, %s330_s13), %s926_s12  ;;  %460 = vmatpush1.msra.mxu0 %v436_v2  ;;  %s354_s20 = scalar_lea.vmem %s1645_s11, %s1660_s21 [#allocation2]  ;;  %v425_v13 = vld [vmem:[#allocation6 + $0x18] sm:$0xff]  ;;  %v424_v15 = vld [vmem:[#allocation6 + $0x10] sm:$0xff]  ;;  %v423_v18 = vld [vmem:[#allocation6 + $0x8] sm:$0xff]  ;;  %vm415_vm4 = vcmask 1045504   ;;  %vm419_vm5 = vcmask 523264   ;;  %vm1425_vm10 = vmmov 0  }
  0x6d   : > { %s1887_s10 = smov (!%p342_p7, %s343_s10), %s932_s15  ;;  %p332_p1 = scmp.gt.s32.totalorder %s1885_s13, 15  ;;  %461 = vmatprep.subr.mxu0 %v1423_v1  ;;  %v355_v16 = vld [vmem:[%s354_s20] sm:$0xff]  ;;  %v445_v23 = vld [vmem:[#allocation6 + $0xb8] sm:$0xff]  ;;  %v444_v26 = vld [vmem:[#allocation6 + $0xb0] sm:$0xff] }
  0x6e   : > { %s333_s17 = ssub.s32 30, %s1885_s13  ;;  %p345_p9 = scmp.gt.s32.totalorder %s1887_s10, 15  ;;  %462 = vmatpush1.msra.mxu0 %v435_v3  ;;  %v422_v20 = vld [vmem:[#allocation6] sm:$0xff]  ;;  %v386_v21 = vrot.slane %v355_v16, 6  ;;  %v604_v28 = vld [vmem:[#allocation8 + $0xf8] sm:$0xff]  ;;  %v603_v30 = vld [vmem:[#allocation8 + $0xf0] sm:$0xff] }
  0x6f   : > { %s346_s5 = ssub.s32 30, %s1887_s10  ;;  %s1889_s17 = smov (!%p332_p1, %s333_s17), %s1885_s13  ;;  %463 = vmatprep.subr.mxu0 %v1423_v1  ;;  %v588_v29 = vld [vmem:[#allocation8 + $0x78] sm:$0xff]  ;;  %v443_v33 = vld [vmem:[#allocation6 + $0xa8] sm:$0xff]  ;;  %967 = vmatprep.subr.mxu1 %v604_v28  ;;  %v587_v34 = vld [vmem:[#allocation8 + $0x70] sm:$0xff] }
  0x70   : > { %s1891_s5 = smov (!%p345_p9, %s346_s5), %s1887_s10  ;;  %464 = vmatpush1.msra.mxu0 %v434_v4  ;;  %p335_p11 = scmp.gt.s32.totalorder %s1889_s17, 0  ;;  %968 = vmatpush3.msra.mxu1 %v588_v29  ;;  %v602_v36 = vld [vmem:[#allocation8 + $0xe8] sm:$0xff]  ;;  %v442_v38 = vld [vmem:[#allocation6 + $0xa0] sm:$0xff]  ;;  %v441_v44 = vld [vmem:[#allocation6 + $0x98] sm:$0xff] }
  0x71   : > { %p927_p5 = scmp.lt.s32.totalorder %s1889_s17, 15  ;;  %465 = vmatprep.subr.mxu0 %v1423_v1  ;;  %p348_p13 = scmp.gt.s32.totalorder %s1891_s5, 0  ;;  %969 = vmatprep.subr.mxu1 %v603_v30  ;;  %v586_v40 = vld [vmem:[#allocation8 + $0x68] sm:$0xff]  ;;  %v601_v42 = vld [vmem:[#allocation8 + $0xe0] sm:$0xff]  ;;  %v440_v47 = vld [vmem:[#allocation6 + $0x90] sm:$0xff] }
  0x72   : > { %p933_p12 = scmp.lt.s32.totalorder %s1891_s5, 15  ;;  %466 = vmatpush1.msra.mxu0 %v433_v5  ;;  %s1893_s17 = smov (!%p335_p11, %s1889_s17), 0  ;;  %970 = vmatpush3.msra.mxu1 %v587_v34  ;;  %v585_v49 = vld [vmem:[#allocation8 + $0x60] sm:$0xff]  ;;  %v600_v50 = vld [vmem:[#allocation8 + $0xd8] sm:$0xff]  ;;  %v439_v51 = vld [vmem:[#allocation6 + $0x88] sm:$0xff] }
  0x73   : > { %467 = vmatprep.subr.mxu0 %v1423_v1  ;;  %s1895_s5 = smov (!%p348_p13, %s1891_s5), 0  ;;  %s1897_s17 = smov (!%p927_p5, %s1893_s17), 15  ;;  %971 = vmatprep.subr.mxu1 %v602_v36  ;;  %v584_v52 = vld [vmem:[#allocation8 + $0x58] sm:$0xff]  ;;  %v438_v53 = vld [vmem:[#allocation6 + $0x80] sm:$0xff]  ;;  %v599_v54 = vld [vmem:[#allocation8 + $0xd0] sm:$0xff] }
  0x74   : > { %468 = vmatpush1.msra.mxu0 %v432_v6  ;;  %s1899_s5 = smov (!%p933_p12, %s1895_s5), 15  ;;  %s339_s18 = scalar_lea.vmem %s1645_s11, %s1897_s17 [#allocation2]  ;;  %972 = vmatpush3.msra.mxu1 %v586_v40  ;;  %v583_v55 = vld [vmem:[#allocation8 + $0x50] sm:$0xff]  ;;  %v598_v56 = vld [vmem:[#allocation8 + $0xc8] sm:$0xff]  ;;  %v597_v62 = vld [vmem:[#allocation8 + $0xc0] sm:$0xff] }
  0x75   : > { %469 = vmatprep.subr.mxu0 %v1423_v1  ;;  %s356_s1 = sadd.s32 8, %s1660_s21  ;;  %s358_s29 = ssub.s32 4294967288, %s1660_s21  ;;  %v340_v19 = vld [vmem:[%s339_s18] sm:$0x1]  ;;  %973 = vmatprep.subr.mxu1 %v601_v42  ;;  %v582_v61 = vld [vmem:[#allocation8 + $0x48] sm:$0xff]  ;;  %v596_v0 = vld [vmem:[#allocation8 + $0xb8] sm:$0xff] }
  0x76   : > { %470 = vmatpush1.msra.mxu0 %v431_v7  ;;  %p357_p0 = scmp.lt.s32.totalorder %s356_s1, 0  ;;  %s369_s19 = sadd.s32 9, %s1660_s21  ;;  %974 = vmatpush3.msra.mxu1 %v585_v49  ;;  %v581_v63 = vld [vmem:[#allocation8 + $0x40] sm:$0xff]  ;;  %v580_v2 = vld [vmem:[#allocation8 + $0x38] sm:$0xff]  ;;  %v595_v3 = vld [vmem:[#allocation8 + $0xb0] sm:$0xff] }
  0x77   : > { %471 = vmatprep.subr.mxu0 %v1423_v1  ;;  %s371_s6 = ssub.s32 4294967287, %s1660_s21  ;;  %s352_s14 = scalar_lea.vmem %s1645_s11, %s1899_s5 [#allocation2]  ;;  %975 = vmatprep.subr.mxu1 %v600_v50  ;;  %v579_v4 = vld [vmem:[#allocation8 + $0x30] sm:$0xff]  ;;  %v594_v5 = vld [vmem:[#allocation8 + $0xa8] sm:$0xff]  ;;  %v593_v7 = vld [vmem:[#allocation8 + $0xa0] sm:$0xff] }
  0x78   : > { %472 = vmatpush1.msra.mxu0 %v430_v8  ;;  %s1901_s29 = smov (!%p357_p0, %s358_s29), %s356_s1  ;;  %p370_p2 = scmp.lt.s32.totalorder %s369_s19, 0  ;;  %v353_v14 = vld [vmem:[%s352_s14] sm:$0x1]  ;;  %976 = vmatpush3.msra.mxu1 %v584_v52  ;;  %v578_v6 = vld [vmem:[#allocation8 + $0x28] sm:$0xff]  ;;  %v620_v42 = vld [vmem:[#allocation8 + $0x178] sm:$0xff] }
  0x79   : > { %473 = vmatprep.subr.mxu0 %v1423_v1  ;;  %p360_p4 = scmp.gt.s32.totalorder %s1901_s29, 15  ;;  %s361_s9 = ssub.s32 30, %s1901_s29  ;;  %v383_v17 = vrot.slane %v353_v14, 7  ;;  %977 = vmatprep.subr.mxu1 %v599_v54  ;;  %v577_v8 = vld [vmem:[#allocation8 + $0x20] sm:$0xff]  ;;  %v574_v14 = vld [vmem:[#allocation8 + $0x8] sm:$0xff]  ;;  %v612_v50 = vld [vmem:[#allocation8 + $0x138] sm:$0xff] }
  0x7a   : > { %474 = vmatpush1.msra.mxu0 %v429_v9  ;;  %s1903_s6 = smov (!%p370_p2, %s371_s6), %s369_s19  ;;  %978 = vmatpush3.msra.mxu1 %v583_v55  ;;  %v592_v9 = vld [vmem:[#allocation8 + $0x98] sm:$0xff]  ;;  %v573_v16 = vld [vmem:[#allocation8] sm:$0xff]  ;;  %s401_s15 = sld [smem:[#allocation9]]  ;;  %v610_v52 = vld [vmem:[#allocation8 + $0x128] sm:$0xff] }
  0x7b   : > { %475 = vmatprep.subr.mxu0 %v1423_v1  ;;  %s1905_s9 = smov (!%p360_p4, %s361_s9), %s1901_s29  ;;  %p373_p6 = scmp.gt.s32.totalorder %s1903_s6, 15  ;;  %v395_v22 = vsel %vm394_vm0, %v340_v19, %v383_v17  ;;  %979 = vmatprep.subr.mxu1 %v598_v56  ;;  %v949_v17 = vld [vmem:[%s1820_s2] ss:$0 sm:$0xff]  ;;  %v608_v54 = vld [vmem:[#allocation8 + $0x118] sm:$0xff]  ;;  %v607_v55 = vld [vmem:[#allocation8 + $0x110] sm:$0xff] }
  0x7c   : > { %476 = vmatpush1.msra.mxu0 %v428_v10  ;;  %s374_s8 = ssub.s32 30, %s1903_s6  ;;  %p363_p8 = scmp.gt.s32.totalorder %s1905_s9, 0  ;;  %v1709_v27 = vsel %vm396_vm1, %v395_v22, %v386_v21  ;;  %980 = vmatpush3.msra.mxu1 %v582_v61  ;;  %v576_v10 = vld [vmem:[#allocation8 + $0x18] sm:$0xff]  ;;  %v613_v49 = vld [vmem:[#allocation8 + $0x140] sm:$0xff]  ;;  %v606_v56 = vld [vmem:[#allocation8 + $0x108] sm:$0xff] }
  0x7d   : > { %477 = vmatprep.subr.mxu0 %v1423_v1  ;;  %p938_p10 = scmp.lt.s32.totalorder %s1905_s9, 15  ;;  %s1907_s8 = smov (!%p373_p6, %s374_s8), %s1903_s6  ;;  %v406_v37 = vrot.slane %v1709_v27, 1  ;;  %v416_v39 = vrot.slane %v1709_v27, 2  ;;  %981 = vmatprep.subr.mxu1 %v597_v62 }
  0x7e   : > { %478 = vmatpush1.msra.mxu0 %v427_v11  ;;  %s364_s16 = scalar_select %p363_p8, %s1905_s9, 0  ;;  %982 = vmatpush3.msra.mxu1 %v581_v63  ;;  %v591_v11 = vld [vmem:[#allocation8 + $0x90] sm:$0xff] }
  0x7f   : > { %479 = vmatprep.subr.mxu0 %v1423_v1  ;;  %p376_p3 = scmp.gt.s32.totalorder %s1907_s8, 0  ;;  %p943_p7 = scmp.lt.s32.totalorder %s1907_s8, 15  ;;  %983 = vmatprep.subr.mxu1 %v596_v0  ;;  %v952_v0 = vld [vmem:[%s1822_s4] ss:$0 sm:$0xff] }
  0x80   : > { %480 = vmatpush1.msra.mxu0 %v426_v12  ;;  %s1909_s16 = smov (!%p938_p10, %s364_s16), 15  ;;  %984 = vmatpush3.msra.mxu1 %v580_v2  ;;  %v575_v12 = vld [vmem:[#allocation8 + $0x10] sm:$0xff]  ;;  %p539_p1 = scmp.eq.s32.totalorder %s1399_s27, 0  ;;  %v534_v19 = vstv %s401_s15 }
  0x81   : > { %481 = vmatprep.subr.mxu0 %v1423_v1  ;;  %s377_s21 = scalar_select %p376_p3, %s1907_s8, 0  ;;  %985 = vmatprep.subr.mxu1 %v595_v3 }
  0x82   : > { %482 = vmatpush1.msra.mxu0 %v425_v13  ;;  %s367_s12 = scalar_lea.vmem %s1645_s11, %s1909_s16 [#allocation2]  ;;  %986 = vmatpush3.msra.mxu1 %v579_v4  ;;  %v590_v13 = vld [vmem:[#allocation8 + $0x88] sm:$0xff]  ;;  %p547_p9 = scmp.eq.s32.totalorder %s1399_s27, 1 }
  0x83   : > { %483 = vmatprep.subr.mxu0 %v1423_v1  ;;  %v368_v24 = vld [vmem:[%s367_s12] sm:$0x1]  ;;  %s1911_s21 = smov (!%p943_p7, %s377_s21), 15  ;;  %987 = vmatprep.subr.mxu1 %v594_v5  ;;  %s948_s20 = sld [smem:[#allocation9 + $0x1]] }
  0x84   : > { %484 = vmatpush1.msra.mxu0 %v424_v15  ;;  %v389_v25 = vrot.slane %v368_v24, 6  ;;  %s380_s13 = scalar_lea.vmem %s1645_s11, %s1911_s21 [#allocation2]  ;;  %s1424_s11 = smov 64   ;;  %988 = vmatpush3.msra.mxu1 %v578_v6  ;;  %v589_v15 = vld [vmem:[#allocation8 + $0x80] sm:$0xff] }
  0x85   : > { %485 = vmatprep.subr.mxu0 %v1423_v1  ;;  %v381_v31 = vld [vmem:[%s380_s13] sm:$0x1]  ;;  %989 = vmatprep.subr.mxu1 %v593_v7  ;;  %s540_s10 = scalar_select %p539_p1, 1, 0 }
  0x86   : > { %486 = vmatpush1.msra.mxu0 %v423_v18  ;;  %v398_v32 = vsel %vm396_vm1, %v386_v21, %v389_v25  ;;  %v392_v35 = vrot.slane %v381_v31, 5  ;;  %990 = vmatpush3.msra.mxu1 %v577_v8  ;;  %s548_s18 = scalar_select %p547_p9, 1, 0 }
  0x87   : > { %487 = vmatprep.subr.mxu0 %v1423_v1  ;;  %991 = vmatprep.subr.mxu1 %v592_v9  ;;  %v541_v21 = vstv %s540_s10  ;;  %s324_s1 = sand.u32 1, %s1379_s22   ;;  %s954_s19 = sshll.u32 %s1403_s28, 1 }
  0x88   : > { %488 = vmatpush1.msra.mxu0 %v422_v20  ;;  %v400_v41 = vsel %vm399_vm2, %v398_v32, %v392_v35  ;;  %992 = vmatpush3.msra.mxu1 %v576_v10  ;;  %vm542_vm7 = vcmp.eq.s32.totalorder %v541_v21, 1  ;;  %v549_v29 = vstv %s548_s18  ;;  %s924_s29 = sshll.u32 %s324_s1, 3  ;;  %s785_s9 = sadd.s32 %s1399_s27, %s954_s19 }
  0x89   : > { %505 = vmatprep.subr.mxu0 %v1423_v1  ;;  %v407_v43 = vrot.slane %v400_v41, 1  ;;  %v417_v45 = vrot.slane %v400_v41, 2  ;;  %993 = vmatprep.subr.mxu1 %v591_v11  ;;  %vm550_vm9 = vcmp.eq.s32.totalorder %v549_v29, 1  ;;  %s1860_s8 = sld [smem:[#allocation17_spill]]  ;;  %s955_s16 = sshll.u32 %s785_s9, 7 }
  0x8a   : > { %506 = vmatpush2.msra.mxu0 %v445_v23  ;;  %994 = vmatpush3.msra.mxu1 %v575_v12  ;;  %s326_s21 = scalar_lea.vmem [#allocation10], %s924_s29  ;;  %s1861_s15 = sld [smem:[#allocation24_spill]] }
  0x8b   : > { %507 = vmatprep.subr.mxu0 %v1423_v1  ;;  %v408_v46 = vsel %vm405_vm3, %v406_v37, %v407_v43  ;;  %v418_v48 = vsel %vm415_vm4, %v416_v39, %v417_v45  ;;  %995 = vmatprep.subr.mxu1 %v590_v13  ;;  %s789_s12 = sshll.u32 %s326_s21, 4  ;;  %s774_s27 = scalar_lea.sflag [#allocation4], %s324_s1  ;;  %s790_s12 = int_to_ptr.vmem [resolvable:$true] %s789_s12 }
  0x8c   : > { %508 = vmatpush2.msra.mxu0 %v444_v26  ;;  %409 = vrot.lane.b32.xlu0 %v408_v46, %s1424_s11  ;;  %v616_v46 = vld [vmem:[#allocation8 + $0x158] sm:$0xff]  ;;  %s1287_s10 = scalar_lea.vmem %s790_s12, 128  ;;  %s1426_s17 = smov [#allocation10]  }
  0x8d   : > { %509 = vmatprep.subr.mxu0 %v1423_v1  ;;  %950 = vmatprep.mubr.msk.f32.mxu0 %vm419_vm5, %v418_v48  ;;  %v614_v48 = vld [vmem:[#allocation8 + $0x148] sm:$0xff]  ;;  %p1288_p11 = scmp.ne.s32.totalorder %s790_s12, %s1287_s10  ;;  %s1291_s5 = sshll.u32 %s1426_s17, 4  ;;  %s1292_s5 = int_to_ptr.vmem [resolvable:$false] %s1291_s5 }
  0x8e   : > { %510 = vmatpush2.msra.mxu0 %v443_v33  ;;  %996 = vmatpush3.msra.mxu1 %v574_v14  ;;  %s1293_s18 = scalar_lea.vmem %s1292_s5, 256  ;;  %p1294_p0 = scmp.lt.s32.totalorder %s790_s12, %s1292_s5 }
  0x8f   : > { %511 = vmatprep.subr.mxu0 %v1423_v1  ;;  %997 = vmatprep.subr.mxu1 %v589_v15  ;;  %p1862_p5 = scmp.ne.s32.totalorder %s1860_s8, 0  ;;  %p1295_p2 = scmp.lt.s32.totalorder %s1293_s18, %s1287_s10 }
  0x90   : > { %512 = vmatpush2.msra.mxu0 %v442_v38  ;;  %411 = vrot.lane.b32.xlu0 %v407_v43, %s1424_s11  ;;  %v619_v43 = vld [vmem:[#allocation8 + $0x170] sm:$0xff]  ;;  %s1763_s28 = scalar_lea.hbm %s1861_s15, %s955_s16 }
  0x91   : > { %513 = vmatprep.subr.mxu0 %v1423_v1  ;;  %998 = vmatpush3.msra.mxu1 %v573_v16  ;;  %p1289_p13 = pnand %p1288_p11, %p1862_p5  ;;  %p1296_p4 = por %p1295_p2, %p1294_p0 }
  0x92   : > { %514 = vmatpush2.msra.mxu0 %v441_v44  ;;  %1019 = vmatprep.subr.mxu1 %v1423_v1  ;;  %v618_v44 = vld [vmem:[#allocation8 + $0x168] sm:$0xff] }
  0x93   : > { %515 = vmatprep.subr.mxu0 %v1423_v1  ;;  %p1290_p12 = pneg %p1289_p13 }
  0x94   : > { %516 = vmatpush2.msra.mxu0 %v440_v47  ;;  %v615_v47 = vld [vmem:[#allocation8 + $0x150] sm:$0xff] }
  0x95   : > { %517 = vmatprep.subr.mxu0 %v1423_v1  ;;  %p1297_p6 = pnand %p1296_p4, %p1290_p12 }
  0x96   : > { %518 = vmatpush2.msra.mxu0 %v439_v51  ;;  %v611_v51 = vld [vmem:[#allocation8 + $0x130] sm:$0xff] }
  0x97   : > { %519 = vmatprep.subr.mxu0 %v1423_v1 }
  0x98   : > { %520 = vmatpush2.msra.mxu0 %v438_v53  ;;  %v609_v53 = vld [vmem:[#allocation8 + $0x120] sm:$0xff] }
  0xfe   : > { %v410_v57 = vpop.permute.xlu0 %409 }
  0xff   : > { %v420_v58 = vsel %vm419_vm5, %v1709_v27, %v410_v57 }
 0x100   : > { %522 = vmatmul.mubr.f32.vlgmr.msra.gmra.mxu0 %v420_v58  ;;  %v605_v58 = vld [vmem:[#allocation8 + $0x100] sm:$0xff] }
 0x101   : > { %951 = vmatprep.mubr.msk.f32.mxu0 %vm419_vm5, %v417_v45  ;;  %v617_v45 = vld [vmem:[#allocation8 + $0x160] sm:$0xff] }
 0x102   : > { %v412_v59 = vpop.permute.xlu0 %411 }
 0x103   : > { %v421_v60 = vsel %vm419_vm5, %v400_v41, %v412_v59 }
 0x104   : > { %527 = vmatmul.mubr.f32.gmra.mxu0 %v421_v60 }
 0x1c0   : > { %v523_v18 = vpop.f32.mrf.mxu0 }
 0x1c1   : > { %v524_v20 = vadd.f32 %v949_v17, %v523_v18 }
 0x1c2   : > { %v525_v22 = vpop.f32.mrf.mxu0 }
 0x1c3   : > { %vm532_vm6 = vcmp.ge.f32.partialorder %v524_v20, 0.0  ;;  %v535_v23 = vmul.f32 %v534_v19, %v524_v20 }
 0x1c4   : > { %v528_v24 = vpop.f32.mrf.mxu0 }
 0x1c5   : > { %v537_v25 = vsel %vm532_vm6, %v524_v20, %v535_v23  ;;  %v529_v26 = vadd.f32 %v949_v17, %v528_v24 }
 0x1c6   : > { %v544_v27 = vrot.slane %v537_v25, 6  ;;  %v530_v28 = vpop.f32.mrf.mxu0 }
 0x1c7   : > { %vm533_vm8 = vcmp.ge.f32.partialorder %v529_v26, 0.0  ;;  %v536_v30 = vmul.f32 %v534_v19, %v529_v26 }
 0x1c8   : > { %v546_v31 = vsel %vm542_vm7, %v537_v25, %v544_v27 }
 0x1c9   : > { %v556_v32 = vrot.slane %v546_v31, 2  ;;  %v538_v33 = vsel %vm533_vm8, %v529_v26, %v536_v30 }
 0x1ca   : > { %v552_v34 = vrot.slane %v538_v33, 2 }
 0x1cb   : > { %v561_v37 = vsel %vm394_vm0, %v556_v32, %v537_v25 }
 0x1cc   : > { %v554_v35 = vsel %vm550_vm9, %v537_v25, %v552_v34  ;;  %v565_v39 = vrot.slane %v561_v37, 1  ;;  %v569_v59 = vrot.slane %v561_v37, 2 }
 0x1cd   : > { %v559_v36 = vrot.slane %v554_v35, 6 }
 0x1cf   : > { %v562_v38 = vsel %vm394_vm0, %v538_v33, %v559_v36 }
 0x1d0   : > { %v566_v40 = vrot.slane %v562_v38, 1  ;;  %v570_v57 = vrot.slane %v562_v38, 2 }
 0x1d2   : > { %v567_v41 = vsel %vm405_vm3, %v565_v39, %v566_v40  ;;  %v571_v60 = vsel %vm415_vm4, %v569_v59, %v570_v57 }
 0x1d3   : > { %692 = vmatprep.mubr.f32.mxu1 %v567_v41 }
 0x1d4   : > { %693 = vmatmul.mubr.f32.vlgmr.msra.gmra.mxu1 %v561_v37 }
 0x1d5   : > { %1020 = vmatpush3.msra.mxu1 %v620_v42  ;;  %1051 = vmatprep.mubr.msk.f32.mxu1 %vm1425_vm10, %v1423_v1 }
 0x1d6   : > { %1021 = vmatprep.subr.mxu1 %v1423_v1 }
 0x1d7   : > { %1022 = vmatpush3.msra.mxu1 %v619_v43 }
 0x1d8   : > { %1023 = vmatprep.subr.mxu1 %v1423_v1 }
 0x1d9   : > { %1024 = vmatpush3.msra.mxu1 %v618_v44 }
 0x1da   : > { %1025 = vmatprep.subr.mxu1 %v1423_v1 }
 0x1db   : > { %1026 = vmatpush3.msra.mxu1 %v617_v45 }
 0x1dc   : > { %1027 = vmatprep.subr.mxu1 %v1423_v1 }
 0x1dd   : > { %1028 = vmatpush3.msra.mxu1 %v616_v46 }
 0x1de   : > { %1029 = vmatprep.subr.mxu1 %v1423_v1 }
 0x1df   : > { %1030 = vmatpush3.msra.mxu1 %v615_v47 }
 0x1e0   : > { %1031 = vmatprep.subr.mxu1 %v1423_v1 }
 0x1e1   : > { %1032 = vmatpush3.msra.mxu1 %v614_v48 }
 0x1e2   : > { %1033 = vmatprep.subr.mxu1 %v1423_v1 }
 0x1e3   : > { %1034 = vmatpush3.msra.mxu1 %v613_v49 }
 0x1e4   : > { %1035 = vmatprep.subr.mxu1 %v1423_v1 }
 0x1e5   : > { %1036 = vmatpush3.msra.mxu1 %v612_v50 }
 0x1e6   : > { %1037 = vmatprep.subr.mxu1 %v1423_v1 }
 0x1e7   : > { %1038 = vmatpush3.msra.mxu1 %v611_v51 }
 0x1e8   : > { %1039 = vmatprep.subr.mxu1 %v1423_v1 }
 0x1e9   : > { %1040 = vmatpush3.msra.mxu1 %v610_v52 }
 0x1ea   : > { %1041 = vmatprep.subr.mxu1 %v1423_v1 }
 0x1eb   : > { %1042 = vmatpush3.msra.mxu1 %v609_v53 }
 0x1ec   : > { %1043 = vmatprep.subr.mxu1 %v1423_v1 }
 0x1ed   : > { %1044 = vmatpush3.msra.mxu1 %v608_v54 }
 0x1ee   : > { %1045 = vmatprep.subr.mxu1 %v1423_v1 }
 0x1ef   : > { %1046 = vmatpush3.msra.mxu1 %v607_v55 }
 0x1f0   : > { %1047 = vmatprep.subr.mxu1 %v1423_v1 }
 0x1f1   : > { %1048 = vmatpush3.msra.mxu1 %v606_v56 }
 0x1f2   : > { %1049 = vmatprep.subr.mxu1 %v1423_v1  ;;  %v769_v1 = vstv %s948_s20 }
 0x1f3   : > { %1050 = vmatpush3.msra.mxu1 %v605_v58 }
 0x1f4   : > { %1052 = vmatmul.mubr.f32.vlgmr.msra.gmra.mxu1 %v571_v60 }
 0x294   : > { %v999_v61 = vpop.f32.mrf.mxu1 }
 0x296   : > { %v1000_v62 = vpop.f32.mrf.mxu1 }
 0x297   : > { %v1001_v63 = vadd.f32 %v1000_v62, %v999_v61 }
 0x299   : > { %v695_v2 = vadd.f32 %v1001_v63, %v952_v0 }
 0x2b4   : > { %v764_v3 = vpop.f32.mrf.mxu1 }
 0x2b5   : > { %v765_v4 = vadd.f32 %v764_v3, %v695_v2 }
 0x2b6   : > { %v1053_v5 = vpop.f32.mrf.mxu1 }
 0x2b7   : > { %vm768_vm11 = vcmp.ge.f32.partialorder %v765_v4, 0.0  ;;  %v770_v6 = vmul.f32 %v769_v1, %v765_v4 }
 0x2b9   : > { %v771_v7 = vsel %vm768_vm11, %v765_v4, %v770_v6 }
 0x2ba   : > { %772 = vst [vmem:[%s326_s21] sm:$0xff] %v771_v7 }
 0x2bb   : > { %1300 = shalt.err (!%p1297_p6)
}
 0x2bc   : > { %s1301_s20 = scalar_lea.hbm %s1763_s28, 128  ;;  %s1305_s19 = scalar_lea.hbm %s1861_s15, 512 }
 0x2bd   : > { %p1302_p8 = scmp.ne.s32.totalorder %s1763_s28, %s1301_s20  ;;  %p1306_p7 = scmp.lt.s32.totalorder %s1763_s28, %s1861_s15 }
 0x2be   : > { %p1307_p1 = scmp.lt.s32.totalorder %s1305_s19, %s1301_s20 }
 0x2bf   : > { %p1303_p10 = pnand %p1302_p8, %p1862_p5 }
 0x2c0   : > { %p1308_p9 = por %p1307_p1, %p1306_p7 }
 0x2c1   : > { %p1304_p3 = pneg %p1303_p10 }
 0x2c3   : > { %p1309_p11 = pnand %p1308_p9, %p1304_p3 }
 0x2c5   : > { %1312 = shalt.err (!%p1309_p11)
}
 0x2c6   : > { %1068 = dma.vmem_to_hbm [thread:$0]  (%p1862_p5), %s790_s12, 128, %s1763_s28, %s774_s27  }
 0x2c7 PF: > { %s1863_s9 = sld [smem:[#allocation15_spill]]  ;;  %p1095_p13 = scmp.ge.s32.totalorder %s1415_s7, 2 }
 0x2c8   : > { %s1864_s16 = sld [smem:[#allocation18_spill]] }
 0x2cd   : > { %s801_s21 = sand.u32 1, %s1863_s9  }
 0x2ce   : > { %p1865_p12 = scmp.ne.s32.totalorder %s1864_s16, 0  ;;  %s802_s13 = scalar_lea.sflag [#allocation4], %s801_s21 }
 0x2d0   : > { %p1085_p0 = pnand %p1095_p13, %p1865_p12 }
 0x2d2   : > { %p1086_p2 = pneg %p1085_p0 }
 0x2d4   : > { %1370 = dma.done.wait (%p1086_p2), %s802_s13, 128  }
 0x2d5   : > { %1372 = vsyncadd (%p1086_p2), %s802_s13, 4294967168  ;;  %s24_s7 = sadd.s32 1, %s1415_s7   ;;  %s1866_s8 = smov %s1617_s24 }
 0x2d6   : > { %p21_p4 = scmp.ge.s32.totalorder %s24_s7, 6   ;;  %s1867_s27 = sld [smem:[#allocation16_spill]] }
 0x2d7   : > { %s1868_s29 = sld [smem:[#allocation19_spill]]  ;;  %s1870_s21 = smov %s1379_s22 }
 0x2d8   : > { %s1869_s12 = sld [smem:[#allocation20_spill]]  ;;  %s1871_s22 = smov %s1383_s23 }
 0x2d9   : > { %s1872_s23 = smov %s1622_s3  ;;  %s1873_s24 = smov %s1391_s25 }
 0x2da   : > { %s1874_s25 = smov %s1395_s26  ;;  %s1875_s26 = smov %s1866_s8 }
 0x2db   : > { %s1876_s28 = smov %s1411_s30  ;;  %23 = sbr.rel (!%p21_p4) target bundleno = 16 (0x10), region = 107 }
 0x2de   : > { %s1877_s30 = smov %s1869_s12 }
 0x2e0   :  { %807 = vsyncpa [#allocation3], 1 }
 0x2e1   :  { %809 = vsyncpa [#allocation3 + $0x1], 1 }
 0x2e2   :  { %810 = vsyncpa [#allocation7], 1 }
 0x2e3   :  { %811 = vsyncpa [#allocation4], 1 }
 0x2e4   :  { %813 = vsyncpa [#allocation4 + $0x1], 1 }
 0x2e5   :  { %814 = vsyncpa [#allocation5], 1 }
 0x2e6   :  { %816 = vsyncpa [#allocation5 + $0x1], 1 }

</bundles_post_ra>
